<compile_context>
chip_gen: v7x
topology: tpu7x:2x2x1
jax: 0.10.0
libtpu: 0.0.40
codegen_flags: <defaults>
</compile_context>

<pallas_src>
import functools

import jax
import jax.numpy as jnp
import numpy as np
from jax import lax
from jax.experimental import pallas as pl
from jax.experimental.pallas import tpu as pltpu

N_FFT = 256
HOP = 16
N_FREQ = N_FFT // 2 + 1      # 129
_HALF = N_FFT // 2           # 128
_GROUPS = N_FFT // HOP       # 16


def _round_up(x, m):
    return ((x + m - 1) // m) * m


def _packed_basis(dtype):
    """(256, 256) window-folded DFT basis, rows = packed frequency.

    rows   0..127 : hann * cos(2*pi*n*k/256), k = 0..127
    row    128    : hann * cos(pi*n)              (k = 128, Nyquist)
    rows 129..255 : hann * sin(2*pi*n*k/256), k = 1..127
    columns       : time-within-frame n = 0..255
    (sign of sin is irrelevant: only the magnitude is returned)
    """
    n = np.arange(N_FFT)
    window = 0.5 * (1.0 - np.cos(2.0 * np.pi * n / N_FFT))   # torch.hann_window(256)
    k_lo = np.arange(_HALF)
    cos_rows = window[None, :] * np.cos(2.0 * np.pi * np.outer(k_lo, n) / N_FFT)
    nyq_row = (window * np.cos(np.pi * n))[None, :]
    k_hi = np.arange(1, _HALF)
    sin_rows = window[None, :] * np.sin(2.0 * np.pi * np.outer(k_hi, n) / N_FFT)
    basis = np.concatenate([cos_rows, nyq_row, sin_rows], axis=0)   # (256, 256)
    return jnp.asarray(basis, dtype=dtype)


def _spectrogram_kernel(frames_ref, basis_ref, out_ref):
    """One (batch, frame-tile) block.

    frames_ref: (tf, N_FFT)   time-major frames (frame index on sublanes)
    basis_ref:  (N_FFT, N_FFT) packed window-folded DFT basis (constant block)
    out_ref:    (N_FREQ, tf)  |STFT| magnitudes, freq-major, frames on lanes
    """
    # One fused MXU pass, contracting the within-frame-time axis of both
    # operands (rows of y = [Re k=0..127, Re k=128, Im k=1..127], frames on
    # lanes -> lane-dense output stores, no transposes needed).
    y = lax.dot_general(
        basis_ref[...], frames_ref[...],
        dimension_numbers=(((1,), (1,)), ((), ())),
        preferred_element_type=jnp.float32)                  # (256, tf) f32

    y_lo = y[0:_HALF, :]          # Re, k = 0..127
    y_hi = y[_HALF:N_FFT, :]      # row 0: Re k=128 ; rows 1..127: Im k=1..127
    # k = 1..127 : |X| = sqrt(Re^2 + Im^2)   (row 0 is fixed up just below)
    out_ref[0:_HALF, :] = jnp.sqrt(y_lo * y_lo + y_hi * y_hi).astype(out_ref.dtype)
    # k = 0 (DC)        : |X| = |Re|   (Im == 0 for real input)
    out_ref[0:1, :] = jnp.abs(y[0:1, :]).astype(out_ref.dtype)
    # k = 128 (Nyquist) : |X| = |Re|
    out_ref[_HALF:N_FREQ, :] = jnp.abs(y[_HALF:_HALF + 1, :]).astype(out_ref.dtype)


@functools.partial(jax.jit,
                   static_argnames=("frame_tile", "compute_dtype", "out_dtype"))
def spectrogram(x, *, frame_tile=2048, compute_dtype=jnp.bfloat16,
                out_dtype=jnp.float32):
    """x: (B, T) waveform -> (B, 129, 1 + T//16) magnitude spectrogram.

    compute_dtype=jnp.float32 is the accuracy escape hatch (bf16 matmul inputs
    give ~0.4% relative error, i.e. amplitude-scaled absolute error).
    out_dtype=jnp.bfloat16 halves output HBM traffic if the consumer allows it.
    """
    B, T = x.shape
    pad = N_FFT // 2
    if T <= pad:
        raise ValueError(f"reflect padding needs T > {pad}, got T={T}")
    n_frames = T // HOP + 1

    # Frame tile: multiple of 128 lanes, up to `frame_tile` frames per step.
    tf = _round_up(min(frame_tile, _round_up(n_frames, 128)), 128)
    if B == 1:
        # v7x: keep >= 2 grid steps so both TensorCores get work.
        tf = min(tf, max(128, _round_up(-(-n_frames // 2), 128)))
    n_tiles = -(-n_frames // tf)
    nf_pad = n_tiles * tf

    # --- glue: center reflect-pad, then slice/reshape framing (no gather, no
    # XLA transpose), produced directly in compute_dtype, time-major.
    x = x.astype(jnp.float32)
    xp = jnp.pad(x, ((0, 0), (pad, pad)), mode="reflect")          # (B, T+256)
    total = HOP * (nf_pad + _GROUPS)
    xp = jnp.pad(xp, ((0, 0), (0, total - (T + 2 * pad))))         # zero tail
    xp = xp.astype(compute_dtype)
    xf = xp.reshape(B, nf_pad + _GROUPS, HOP)                      # hop-folded
    # frames[b, t, 16*g + r] = xp[b, 16*t + 16*g + r]
    frames = jnp.concatenate(
        [xf[:, g:g + nf_pad, :] for g in range(_GROUPS)], axis=2)  # (B, nf_pad, 256)

    basis = _packed_basis(compute_dtype)

    # Ragged last output block: Pallas clips the write-back to n_frames, so no
    # post-kernel crop copy is needed.
    out = pl.pallas_call(
        _spectrogram_kernel,
        out_shape=jax.ShapeDtypeStruct((B, N_FREQ, n_frames), out_dtype),
        grid_spec=pltpu.PrefetchScalarGridSpec(
            num_scalar_prefetch=0,
            grid=(B, n_tiles),
            in_specs=[
                # frames for (batch b, frame tile j); batch dim squeezed
                pl.BlockSpec((None, tf, N_FFT), lambda b, j: (b, j, 0)),
                # constant basis: same block every step -> DMA'd once
                pl.BlockSpec((N_FFT, N_FFT), lambda b, j: (0, 0)),
            ],
            out_specs=pl.BlockSpec((None, N_FREQ, tf), lambda b, j: (b, 0, j)),
        ),
        compiler_params=pltpu.CompilerParams(
            dimension_semantics=("parallel", "parallel"),
            vmem_limit_bytes=48 * 1024 * 1024,
        ),
    )(frames, basis)
    return out


def _reference(x, n_frames):
    pad = N_FFT // 2
    xp = jnp.pad(x, ((0, 0), (pad, pad)), mode="reflect")
    idx = jnp.arange(n_frames)[:, None] * HOP + jnp.arange(N_FFT)[None, :]
    fr = xp[:, idx]                                       # (B, n_frames, 256)
    win = 0.5 * (1.0 - jnp.cos(2.0 * jnp.pi * jnp.arange(N_FFT) / N_FFT))
    return jnp.transpose(jnp.abs(jnp.fft.rfft(fr * win, axis=-1)), (0, 2, 1))


if __name__ == "__main__":
    key = jax.random.PRNGKey(0)

    # Small case: single ragged tile per batch element.
    B, T = 2, 512
    x = jax.random.normal(key, (B, T), dtype=jnp.float32)
    spec = jax.block_until_ready(spectrogram(x))
    n_frames = T // HOP + 1
    assert spec.shape == (B, N_FREQ, n_frames), spec.shape
    assert spec.dtype == jnp.float32
    assert bool(jnp.all(jnp.isfinite(spec)))
    max_err = float(jnp.max(jnp.abs(spec - _reference(x, n_frames))))
    assert max_err < 0.25, f"max abs error vs rFFT reference: {max_err}"

    # B==1 case: exercises the two-tile split (v7x two-TC path) + ragged tail.
    B2, T2 = 1, 2560
    x2 = jax.random.normal(jax.random.PRNGKey(1), (B2, T2), dtype=jnp.float32)
    spec2 = jax.block_until_ready(spectrogram(x2))
    n_frames2 = T2 // HOP + 1
    assert spec2.shape == (B2, N_FREQ, n_frames2), spec2.shape
    assert bool(jnp.all(jnp.isfinite(spec2)))
    max_err2 = float(jnp.max(jnp.abs(spec2 - _reference(x2, n_frames2))))
    assert max_err2 < 0.25, f"max abs error vs rFFT reference: {max_err2}"

    print("KERNEL_OK")
</pallas_src>

<mosaic_0001>
module attributes {stable_mosaic.version = 11 : i64} {
  func.func @_spectrogram_kernel(%arg0: i32, %arg1: i32, %arg2: memref<1x128x256xbf16, #tpu.memory_space<vmem>>, %arg3: memref<256x256xbf16, #tpu.memory_space<vmem>>, %arg4: memref<1x129x128xf32, #tpu.memory_space<vmem>>) attributes {dimension_semantics = [#tpu.dimension_semantics<parallel>, #tpu.dimension_semantics<parallel>], iteration_bounds = array<i64: 2, 1>, scalar_prefetch = 0 : i64, scratch_operands = 0 : i64, tpu.core_type = #tpu.core_type<tc>, window_params = [{transform_indices = @transform_0, window_bounds = array<i64: 1, 128, 256>}, {pipeline_mode = #tpu.pipeline_mode<synchronous>, transform_indices = @transform_1, window_bounds = array<i64: 256, 256>}, {transform_indices = @transform_2, window_bounds = array<i64: 1, 129, 128>}]} {
    %c0 = arith.constant 0 : index
    %c0_0 = arith.constant 0 : index
    %0 = vector.load %arg3[%c0, %c0_0] : memref<256x256xbf16, #tpu.memory_space<vmem>>, vector<256x256xbf16>
    %c0_1 = arith.constant 0 : index
    %c0_2 = arith.constant 0 : index
    %c0_3 = arith.constant 0 : index
    %1 = vector.load %arg2[%c0_1, %c0_2, %c0_3] : memref<1x128x256xbf16, #tpu.memory_space<vmem>>, vector<1x128x256xbf16>
    %2 = vector.shape_cast %1 : vector<1x128x256xbf16> to vector<128x256xbf16>
    %cst = arith.constant dense<0.000000e+00> : vector<256x128xf32>
    %3 = tpu.matmul %0, %2, %cst {dimension_numbers = #tpu.dot_dimension_numbers<[1], [1], [0], [0], [0, 0, 1, 0], [], []>} : vector<256x256xbf16>, vector<128x256xbf16>, vector<256x128xf32> -> vector<256x128xf32>
    %4 = vector.extract_strided_slice %3 {offsets = [0, 0], sizes = [128, 128], strides = [1, 1]} : vector<256x128xf32> to vector<128x128xf32>
    %5 = vector.extract_strided_slice %3 {offsets = [128, 0], sizes = [128, 128], strides = [1, 1]} : vector<256x128xf32> to vector<128x128xf32>
    %6 = arith.mulf %4, %4 : vector<128x128xf32>
    %7 = arith.mulf %5, %5 : vector<128x128xf32>
    %8 = arith.addf %6, %7 : vector<128x128xf32>
    %9 = math.sqrt %8 : vector<128x128xf32>
    %c0_4 = arith.constant 0 : index
    %c0_5 = arith.constant 0 : index
    %c0_6 = arith.constant 0 : index
    %10 = vector.load %arg4[%c0_4, %c0_5, %c0_6] : memref<1x129x128xf32, #tpu.memory_space<vmem>>, vector<1x128x128xf32>
    %11 = vector.shape_cast %10 : vector<1x128x128xf32> to vector<128x128xf32>
    %12 = vector.shape_cast %9 : vector<128x128xf32> to vector<1x128x128xf32>
    tpu.vector_store %arg4[%c0_4, %c0_5, %c0_6], %12 {strides = array<i32>} : memref<1x129x128xf32, #tpu.memory_space<vmem>>, vector<1x128x128xf32>,
    %13 = vector.extract_strided_slice %3 {offsets = [0, 0], sizes = [1, 128], strides = [1, 1]} : vector<256x128xf32> to vector<1x128xf32>
    %14 = math.absf %13 : vector<1x128xf32>
    %c0_7 = arith.constant 0 : index
    %c0_8 = arith.constant 0 : index
    %c0_9 = arith.constant 0 : index
    %15 = vector.load %arg4[%c0_7, %c0_8, %c0_9] : memref<1x129x128xf32, #tpu.memory_space<vmem>>, vector<1x1x128xf32>
    %16 = vector.shape_cast %15 : vector<1x1x128xf32> to vector<1x128xf32>
    %17 = vector.shape_cast %14 : vector<1x128xf32> to vector<1x1x128xf32>
    tpu.vector_store %arg4[%c0_7, %c0_8, %c0_9], %17 {strides = array<i32>} : memref<1x129x128xf32, #tpu.memory_space<vmem>>, vector<1x1x128xf32>,
    %18 = vector.extract_strided_slice %3 {offsets = [128, 0], sizes = [1, 128], strides = [1, 1]} : vector<256x128xf32> to vector<1x128xf32>
    %19 = math.absf %18 : vector<1x128xf32>
    %c0_10 = arith.constant 0 : index
    %c128 = arith.constant 128 : index
    %c0_11 = arith.constant 0 : index
    %20 = vector.load %arg4[%c0_10, %c128, %c0_11] : memref<1x129x128xf32, #tpu.memory_space<vmem>>, vector<1x1x128xf32>
    %21 = vector.shape_cast %20 : vector<1x1x128xf32> to vector<1x128xf32>
    %22 = vector.shape_cast %19 : vector<1x128xf32> to vector<1x1x128xf32>
    tpu.vector_store %arg4[%c0_10, %c128, %c0_11], %22 {strides = array<i32>} : memref<1x129x128xf32, #tpu.memory_space<vmem>>, vector<1x1x128xf32>,
    return
  }
  func.func @transform_0(%arg0: i32, %arg1: i32) -> (i32, i32, i32) {
    %c0_i32 = arith.constant 0 : i32
    %c0_i32_0 = arith.constant 0 : i32
    return %arg0, %arg1, %c0_i32 : i32, i32, i32
  }
  func.func @transform_1(%arg0: i32, %arg1: i32) -> (i32, i32) {
    %c0_i32 = arith.constant 0 : i32
    %c0_i32_0 = arith.constant 0 : i32
    %c0_i32_1 = arith.constant 0 : i32
    return %c0_i32, %c0_i32_0 : i32, i32
  }
  func.func @transform_2(%arg0: i32, %arg1: i32) -> (i32, i32, i32) {
    %c0_i32 = arith.constant 0 : i32
    %c0_i32_0 = arith.constant 0 : i32
    return %arg0, %c0_i32, %arg1 : i32, i32, i32
  }
}

</mosaic_0001>

<bundles_post_ra>
// kernel: spectrogram.1
= control target key start
LH: loop header
LB: loop body
LE: loop exit
PB: predicated region body
PF: predicated region fallthrough
CT: control target
= control target key end

     0   :  { %s1142_s9 = smov 0   ;;  %s1144_s10 = smov 0   ;;  %s1385_s0 = inlined_call_operand.vmem [shape: bf16[2,128,256], index: 0, kind: input, shape index: {}]   ;;  %s1386_s1 = inlined_call_operand.vmem [shape: bf16[256,256], index: 1, kind: input, shape index: {}]   ;;  %s1387_s2 = inlined_call_operand.vmem [shape: f32[2,129,33], index: 2, kind: output, shape index: {}]  }
   0x1   :  { %s1146_s11 = smov 0  }
   0x2 LB: > { %s24_s12 = sadd.s32 1, %s1121_s10  ;;  %p903_p0 = scmp.ge.s32.totalorder %s1125_s11, 1  ;;  %s1125_s11 = sphi %s1146_s11, %s12_s11   ;;  %s1121_s10 = sphi %s1144_s10, %s1389_s10   ;;  %s1117_s9 = sphi %s1142_s9, %s1388_s9  }
   0x3   : > { %p26_p1 = scmp.ge.s32.totalorder %s24_s12, 2  ;;  %p134_p2 = scmp.lt.s32.totalorder %s1125_s11, 3 }
   0x5   : > { %s1391_s12 = smov (%p26_p1, %s24_s12), 0  ;;  %p135_p3 = pnand %p903_p0, %p134_p2 }
   0x6   : > { %p165_p4 = scmp.lt.s32.totalorder (!%p135_p3), %s1117_s9, 1  ;;  %v1025_v0 = vld [vmem:[%s1386_s1 + $0x4] ss:$8 sps:$4 sm:$0xff] (!%p135_p3)   ;;  %v1023_v18 = vld [vmem:[%s1386_s1] ss:$8 sps:$4 sm:$0xff] (!%p135_p3)  }
   0x7   : > { %138 = sbr.rel (%p135_p3) target bundleno = 373 (0x175), region = 28  ;;  %v1028_v1 = vld [vmem:[%s1386_s1 + $0x84] ss:$8 sps:$4 sm:$0xff] (!%p135_p3)   ;;  %504 = vmatprep.mubr.bf16.mxu0 (!%p135_p3), %v1025_v0  ;;  %v1026_v19 = vld [vmem:[%s1386_s1 + $0x80] ss:$8 sps:$4 sm:$0xff] (!%p135_p3)  }
   0x8   : > { %568 = vmatprep.mubr.bf16.mxu1 (!%p135_p3), %v1028_v1  ;;  %v1029_v20 = vld [vmem:[%s1386_s1 + $0x14] ss:$8 sps:$4 sm:$0xff] (!%p135_p3)   ;;  %v1033_v22 = vld [vmem:[%s1386_s1 + $0x10] ss:$8 sps:$4 sm:$0xff] (!%p135_p3)   ;;  %v1035_v24 = vld [vmem:[%s1386_s1 + $0x24] ss:$8 sps:$4 sm:$0xff] (!%p135_p3)  }
   0x9   : > { %v1031_v21 = vld [vmem:[%s1386_s1 + $0x94] ss:$8 sps:$4 sm:$0xff] (!%p135_p3)   ;;  %v1034_v23 = vld [vmem:[%s1386_s1 + $0x90] ss:$8 sps:$4 sm:$0xff] (!%p135_p3)   ;;  %v1037_v25 = vld [vmem:[%s1386_s1 + $0xa4] ss:$8 sps:$4 sm:$0xff] (!%p135_p3)  }
   0xa   : > { %v1039_v26 = vld [vmem:[%s1386_s1 + $0x20] ss:$8 sps:$4 sm:$0xff] (!%p135_p3)   ;;  %v1041_v28 = vld [vmem:[%s1386_s1 + $0x34] ss:$8 sps:$4 sm:$0xff] (!%p135_p3)   ;;  %v1045_v30 = vld [vmem:[%s1386_s1 + $0x30] ss:$8 sps:$4 sm:$0xff] (!%p135_p3)  }
   0xb   : > { %v1040_v27 = vld [vmem:[%s1386_s1 + $0xa0] ss:$8 sps:$4 sm:$0xff] (!%p135_p3)   ;;  %v1043_v29 = vld [vmem:[%s1386_s1 + $0xb4] ss:$8 sps:$4 sm:$0xff] (!%p135_p3)   ;;  %v1046_v31 = vld [vmem:[%s1386_s1 + $0xb0] ss:$8 sps:$4 sm:$0xff] (!%p135_p3)  }
   0xc   : > { %v1047_v32 = vld [vmem:[%s1386_s1 + $0x44] ss:$8 sps:$4 sm:$0xff] (!%p135_p3)   ;;  %v1051_v34 = vld [vmem:[%s1386_s1 + $0x40] ss:$8 sps:$4 sm:$0xff] (!%p135_p3)   ;;  %v1053_v36 = vld [vmem:[%s1386_s1 + $0x54] ss:$8 sps:$4 sm:$0xff] (!%p135_p3)  }
   0xd   : > { %v1049_v33 = vld [vmem:[%s1386_s1 + $0xc4] ss:$8 sps:$4 sm:$0xff] (!%p135_p3)   ;;  %v1052_v35 = vld [vmem:[%s1386_s1 + $0xc0] ss:$8 sps:$4 sm:$0xff] (!%p135_p3)   ;;  %v1055_v37 = vld [vmem:[%s1386_s1 + $0xd4] ss:$8 sps:$4 sm:$0xff] (!%p135_p3)  }
   0xe   : > { %s1393_s9 = smov (!%p165_p4, %s1117_s9), 1  ;;  %v1057_v38 = vld [vmem:[%s1386_s1 + $0x50] ss:$8 sps:$4 sm:$0xff]   ;;  %v1059_v40 = vld [vmem:[%s1386_s1 + $0x64] ss:$8 sps:$4 sm:$0xff]  }
   0xf   : > { %s957_s17 = sshll.u32 %s1393_s9, 7  ;;  %v1058_v39 = vld [vmem:[%s1386_s1 + $0xd0] ss:$8 sps:$4 sm:$0xff]   ;;  %v1061_v41 = vld [vmem:[%s1386_s1 + $0xe4] ss:$8 sps:$4 sm:$0xff]   ;;  %s974_s5 = smul.u32 136, %s1393_s9 }
  0x10   : > { %s1172_s20 = scalar_lea.vmem %s1385_s0, %s957_s17  ;;  %v1063_v42 = vld [vmem:[%s1386_s1 + $0x60] ss:$8 sps:$4 sm:$0xff]   ;;  %v1065_v44 = vld [vmem:[%s1386_s1 + $0x74] ss:$8 sps:$4 sm:$0xff]   ;;  %v1069_v46 = vld [vmem:[%s1386_s1 + $0x70] ss:$8 sps:$4 sm:$0xff]  }
  0x11   : > { %v999_v2 = vld [vmem:[%s1172_s20 + $0x4] ss:$8 sps:$4 sm:$0xff]   ;;  %v1001_v3 = vld [vmem:[%s1172_s20] ss:$8 sps:$4 sm:$0xff]   ;;  %v1002_v4 = vld [vmem:[%s1172_s20 + $0x14] ss:$8 sps:$4 sm:$0xff]   ;;  %s1284_s8 = scalar_lea.vmem %s1387_s2, %s974_s5 }
  0x12   : > { %472 = vmatprep.subr.bf16.mxu0 %v999_v2  ;;  %958 = vmatprep.subr.bf16.mxu1 %v999_v2  ;;  %v1004_v5 = vld [vmem:[%s1172_s20 + $0x10] ss:$8 sps:$4 sm:$0xff]   ;;  %v1005_v6 = vld [vmem:[%s1172_s20 + $0x24] ss:$8 sps:$4 sm:$0xff]   ;;  %v1007_v7 = vld [vmem:[%s1172_s20 + $0x20] ss:$8 sps:$4 sm:$0xff]  }
  0x13   : > { %473 = vmatpush1.bf16.xpose.msra.mxu0 %v1001_v3  ;;  %966 = vmatpush1.bf16.xpose.msra.mxu1 %v1001_v3  ;;  %v1008_v8 = vld [vmem:[%s1172_s20 + $0x34] ss:$8 sps:$4 sm:$0xff]   ;;  %v1010_v9 = vld [vmem:[%s1172_s20 + $0x30] ss:$8 sps:$4 sm:$0xff]   ;;  %v1011_v10 = vld [vmem:[%s1172_s20 + $0x44] ss:$8 sps:$4 sm:$0xff]  }
  0x14   : > { %474 = vmatprep.subr.bf16.mxu0 %v1002_v4  ;;  %959 = vmatprep.subr.bf16.mxu1 %v1002_v4  ;;  %v1013_v11 = vld [vmem:[%s1172_s20 + $0x40] ss:$8 sps:$4 sm:$0xff]   ;;  %v1014_v12 = vld [vmem:[%s1172_s20 + $0x54] ss:$8 sps:$4 sm:$0xff]   ;;  %v1016_v13 = vld [vmem:[%s1172_s20 + $0x50] ss:$8 sps:$4 sm:$0xff]  }
  0x15   : > { %v1017_v14 = vld [vmem:[%s1172_s20 + $0x64] ss:$8 sps:$4 sm:$0xff]   ;;  %v1019_v15 = vld [vmem:[%s1172_s20 + $0x60] ss:$8 sps:$4 sm:$0xff]   ;;  %v1020_v16 = vld [vmem:[%s1172_s20 + $0x74] ss:$8 sps:$4 sm:$0xff]  }
  0x16   : > { %v1022_v17 = vld [vmem:[%s1172_s20 + $0x70] ss:$8 sps:$4 sm:$0xff]   ;;  %v1064_v43 = vld [vmem:[%s1386_s1 + $0xe0] ss:$8 sps:$4 sm:$0xff]   ;;  %v1067_v45 = vld [vmem:[%s1386_s1 + $0xf4] ss:$8 sps:$4 sm:$0xff]  }
  0x17   : > { %v1070_v47 = vld [vmem:[%s1386_s1 + $0xf0] ss:$8 sps:$4 sm:$0xff]  }
  0x1b   : > { %475 = vmatpush1.bf16.xpose.msra.mxu0 %v1004_v5  ;;  %967 = vmatpush1.bf16.xpose.msra.mxu1 %v1004_v5 }
  0x1c   : > { %476 = vmatprep.subr.bf16.mxu0 %v1005_v6  ;;  %960 = vmatprep.subr.bf16.mxu1 %v1005_v6 }
  0x23   : > { %477 = vmatpush1.bf16.xpose.msra.mxu0 %v1007_v7  ;;  %968 = vmatpush1.bf16.xpose.msra.mxu1 %v1007_v7 }
  0x24   : > { %478 = vmatprep.subr.bf16.mxu0 %v1008_v8  ;;  %961 = vmatprep.subr.bf16.mxu1 %v1008_v8 }
  0x2b   : > { %479 = vmatpush1.bf16.xpose.msra.mxu0 %v1010_v9  ;;  %969 = vmatpush1.bf16.xpose.msra.mxu1 %v1010_v9 }
  0x2c   : > { %480 = vmatprep.subr.bf16.mxu0 %v1011_v10  ;;  %962 = vmatprep.subr.bf16.mxu1 %v1011_v10 }
  0x33   : > { %481 = vmatpush1.bf16.xpose.msra.mxu0 %v1013_v11  ;;  %970 = vmatpush1.bf16.xpose.msra.mxu1 %v1013_v11 }
  0x34   : > { %482 = vmatprep.subr.bf16.mxu0 %v1014_v12  ;;  %963 = vmatprep.subr.bf16.mxu1 %v1014_v12 }
  0x3b   : > { %483 = vmatpush1.bf16.xpose.msra.mxu0 %v1016_v13  ;;  %971 = vmatpush1.bf16.xpose.msra.mxu1 %v1016_v13 }
  0x3c   : > { %484 = vmatprep.subr.bf16.mxu0 %v1017_v14  ;;  %964 = vmatprep.subr.bf16.mxu1 %v1017_v14 }
  0x43   : > { %485 = vmatpush1.bf16.xpose.msra.mxu0 %v1019_v15  ;;  %972 = vmatpush1.bf16.xpose.msra.mxu1 %v1019_v15 }
  0x44   : > { %486 = vmatprep.subr.bf16.mxu0 %v1020_v16  ;;  %965 = vmatprep.subr.bf16.mxu1 %v1020_v16 }
  0x4b   : > { %487 = vmatpush1.bf16.xpose.msra.mxu0 %v1022_v17  ;;  %973 = vmatpush1.bf16.xpose.msra.mxu1 %v1022_v17 }
  0x52   : > { %505 = vmatmul.mubr.bf16.vlgmr.msra.gmra.mrb[0].mxu0 %v1023_v18  ;;  %569 = vmatmul.mubr.bf16.vlgmr.msra.gmra.mrb[0].mxu1 %v1026_v19 }
  0x53   : > { %512 = vmatprep.mubr.bf16.mxu0 %v1029_v20  ;;  %576 = vmatprep.mubr.bf16.mxu1 %v1031_v21 }
  0x5a   : > { %513 = vmatmul.mubr.bf16.gmra.mrb[4].mxu0 %v1033_v22  ;;  %577 = vmatmul.mubr.bf16.gmra.mrb[4].mxu1 %v1034_v23 }
  0x5b   : > { %520 = vmatprep.mubr.bf16.mxu0 %v1035_v24  ;;  %584 = vmatprep.mubr.bf16.mxu1 %v1037_v25 }
  0x62   : > { %521 = vmatmul.mubr.bf16.gmra.mrb[8].mxu0 %v1039_v26  ;;  %585 = vmatmul.mubr.bf16.gmra.mrb[8].mxu1 %v1040_v27 }
  0x63   : > { %528 = vmatprep.mubr.bf16.mxu0 %v1041_v28  ;;  %592 = vmatprep.mubr.bf16.mxu1 %v1043_v29 }
  0x6a   : > { %529 = vmatmul.mubr.bf16.gmra.mrb[12].mxu0 %v1045_v30  ;;  %593 = vmatmul.mubr.bf16.gmra.mrb[12].mxu1 %v1046_v31 }
  0x6b   : > { %536 = vmatprep.mubr.bf16.mxu0 %v1047_v32  ;;  %600 = vmatprep.mubr.bf16.mxu1 %v1049_v33 }
  0x72   : > { %537 = vmatmul.mubr.bf16.gmra.mrb[16].mxu0 %v1051_v34  ;;  %601 = vmatmul.mubr.bf16.gmra.mrb[16].mxu1 %v1052_v35 }
  0x73   : > { %544 = vmatprep.mubr.bf16.mxu0 %v1053_v36  ;;  %608 = vmatprep.mubr.bf16.mxu1 %v1055_v37 }
  0x7a   : > { %545 = vmatmul.mubr.bf16.gmra.mrb[20].mxu0 %v1057_v38  ;;  %609 = vmatmul.mubr.bf16.gmra.mrb[20].mxu1 %v1058_v39 }
  0x7b   : > { %552 = vmatprep.mubr.bf16.mxu0 %v1059_v40  ;;  %616 = vmatprep.mubr.bf16.mxu1 %v1061_v41 }
  0x82   : > { %553 = vmatmul.mubr.bf16.gmra.mrb[24].mxu0 %v1063_v42  ;;  %617 = vmatmul.mubr.bf16.gmra.mrb[24].mxu1 %v1064_v43 }
  0x83   : > { %560 = vmatprep.mubr.bf16.mxu0 %v1065_v44  ;;  %624 = vmatprep.mubr.bf16.mxu1 %v1067_v45 }
  0x8a   : > { %561 = vmatmul.mubr.bf16.gmra.mrb[28].mxu0 %v1069_v46  ;;  %625 = vmatmul.mubr.bf16.gmra.mrb[28].mxu1 %v1070_v47 }
 0x125   : > { %v506_v48 = vpop.f32.mrb[0].mxu0  ;;  %v570_v49 = vpop.f32.mrb[0].mxu1 }
 0x126   : > { %v633_v50 = vmul.f32 %v506_v48, %v506_v48  ;;  %v649_v51 = vmul.f32 %v570_v49, %v570_v49  ;;  %v811_v52 = vand.u32 2147483647, %v570_v49  ;;  %v508_v53 = vpop.f32.mrb[1].mxu0  ;;  %v572_v54 = vpop.f32.mrb[1].mxu1  ;;  %v809_v23 = vand.u32 2147483647, %v506_v48 }
 0x127   : > { %v509_v55 = vpop.f32.mrb[2].mxu0  ;;  %v573_v56 = vpop.f32.mrb[2].mxu1 }
 0x128   : > { %v665_v57 = vadd.f32 %v649_v51, %v633_v50  ;;  %812 = vst [vmem:[%s1284_s8 + $0x80] sm:$0x1] %v811_v52  ;;  %v634_v58 = vmul.f32 %v509_v55, %v509_v55  ;;  %v650_v59 = vmul.f32 %v573_v56, %v573_v56  ;;  %v511_v60 = vpop.f32.mrb[3].mxu0  ;;  %v575_v61 = vpop.f32.mrb[3].mxu1 }
 0x12a   : > { %1071 = vrsqrt.f32 %v665_v57  ;;  %v666_v62 = vadd.f32 %v650_v59, %v634_v58  ;;  %vm683_vm0 = vcmp.eq.f32.partialorder %v665_v57, inf  ;;  %v686_v17 = vand.u32 2147483648, %v665_v57 }
 0x12b   : > { %vm685_vm1 = vcmp.eq.f32.partialorder %v665_v57, 0.0 }
 0x12c   : > { %1073 = vrsqrt.f32 %v666_v62  ;;  %vm690_vm2 = vcmp.eq.f32.partialorder %v666_v62, inf  ;;  %v693_v33 = vand.u32 2147483648, %v666_v62  ;;  %vm692_vm3 = vcmp.eq.f32.partialorder %v666_v62, 0.0 }
 0x12d   : > { %v514_v63 = vpop.f32.mrb[4].mxu0  ;;  %v578_v0 = vpop.f32.mrb[4].mxu1 }
 0x12e   : > { %v635_v1 = vmul.f32 %v514_v63, %v514_v63  ;;  %v651_v2 = vmul.f32 %v578_v0, %v578_v0  ;;  %v516_v3 = vpop.f32.mrb[5].mxu0  ;;  %v580_v4 = vpop.f32.mrb[5].mxu1 }
 0x12f   : > { %v517_v5 = vpop.f32.mrb[6].mxu0  ;;  %v581_v6 = vpop.f32.mrb[6].mxu1 }
 0x130   : > { %v667_v7 = vadd.f32 %v651_v2, %v635_v1  ;;  %v636_v8 = vmul.f32 %v517_v5, %v517_v5  ;;  %v652_v9 = vmul.f32 %v581_v6, %v581_v6  ;;  %v519_v10 = vpop.f32.mrb[7].mxu0  ;;  %v583_v11 = vpop.f32.mrb[7].mxu1 }
 0x132   : > { %1075 = vrsqrt.f32 %v667_v7  ;;  %v1287_v12 = vadd.f32 %v652_v9, %v636_v8  ;;  %vm697_vm4 = vcmp.eq.f32.partialorder %v667_v7, inf  ;;  %v700_v42 = vand.u32 2147483648, %v667_v7 }
 0x133   : > { %vm699_vm5 = vcmp.eq.f32.partialorder %v667_v7, 0.0 }
 0x134   : > { %v1072_v13 = vpop.eup %1071  ;;  %1077 = vrsqrt.f32 %v1287_v12  ;;  %vm704_vm6 = vcmp.eq.f32.partialorder %v1287_v12, inf  ;;  %vm706_vm7 = vcmp.eq.f32.partialorder %v1287_v12, 0.0 }
 0x135   : > { %v682_v14 = vmul.f32 %v1072_v13, %v665_v57  ;;  %v522_v15 = vpop.f32.mrb[8].mxu0  ;;  %v586_v16 = vpop.f32.mrb[8].mxu1 }
 0x136   : > { %v637_v18 = vmul.f32 %v522_v15, %v522_v15  ;;  %v653_v19 = vmul.f32 %v586_v16, %v586_v16  ;;  %v524_v20 = vpop.f32.mrb[9].mxu0  ;;  %v588_v21 = vpop.f32.mrb[9].mxu1 }
 0x137   : > { %v1074_v22 = vpop.eup %1073  ;;  %v684_v24 = vsel %vm683_vm0, %v665_v57, %v682_v14  ;;  %v525_v25 = vpop.f32.mrb[10].mxu0  ;;  %v707_v57 = vand.u32 2147483648, %v1287_v12 }
 0x138   : > { %v589_v26 = vpop.f32.mrb[10].mxu1  ;;  %v687_v27 = vsel %vm685_vm1, %v686_v17, %v684_v24  ;;  %v689_v28 = vmul.f32 %v1074_v22, %v666_v62  ;;  %v1290_v29 = vadd.f32 %v653_v19, %v637_v18  ;;  %v638_v30 = vmul.f32 %v525_v25, %v525_v25  ;;  %v527_v31 = vpop.f32.mrb[11].mxu0 }
 0x139   : > { %v591_v32 = vpop.f32.mrb[11].mxu1  ;;  %793 = vst [vmem:[%s1284_s8] sm:$0xff] %v687_v27  ;;  %v654_v34 = vmul.f32 %v589_v26, %v589_v26 }
 0x13a   : > { %810 = vst [vmem:[%s1284_s8] sm:$0x1] %v809_v23  ;;  %v691_v35 = vsel %vm690_vm2, %v666_v62, %v689_v28  ;;  %1079 = vrsqrt.f32 %v1290_v29  ;;  %vm711_vm8 = vcmp.eq.f32.partialorder %v1290_v29, inf  ;;  %v714_v2 = vand.u32 2147483648, %v1290_v29 }
 0x13b   : > { %v694_v36 = vsel %vm692_vm3, %v693_v33, %v691_v35  ;;  %v1295_v37 = vadd.f32 %v654_v34, %v638_v30  ;;  %vm713_vm9 = vcmp.eq.f32.partialorder %v1290_v29, 0.0 }
 0x13c   : > { %v1076_v38 = vpop.eup %1075  ;;  %794 = vst [vmem:[%s1284_s8 + $0x8] sm:$0xff] %v694_v36 }
 0x13d   : > { %v696_v39 = vmul.f32 %v1076_v38, %v667_v7  ;;  %1081 = vrsqrt.f32 %v1295_v37  ;;  %v530_v40 = vpop.f32.mrb[12].mxu0  ;;  %v594_v41 = vpop.f32.mrb[12].mxu1  ;;  %vm718_vm10 = vcmp.eq.f32.partialorder %v1295_v37, inf  ;;  %v721_v17 = vand.u32 2147483648, %v1295_v37 }
 0x13e   : > { %v639_v43 = vmul.f32 %v530_v40, %v530_v40  ;;  %v655_v44 = vmul.f32 %v594_v41, %v594_v41  ;;  %v532_v45 = vpop.f32.mrb[13].mxu0  ;;  %v596_v46 = vpop.f32.mrb[13].mxu1  ;;  %vm720_vm11 = vcmp.eq.f32.partialorder %v1295_v37, 0.0 }
 0x13f   : > { %v1078_v47 = vpop.eup %1077  ;;  %v698_v48 = vsel %vm697_vm4, %v667_v7, %v696_v39  ;;  %v533_v49 = vpop.f32.mrb[14].mxu0 }
 0x140   : > { %v597_v50 = vpop.f32.mrb[14].mxu1  ;;  %v701_v51 = vsel %vm699_vm5, %v700_v42, %v698_v48  ;;  %v703_v52 = vmul.f32 %v1078_v47, %v1287_v12  ;;  %v1300_v53 = vadd.f32 %v655_v44, %v639_v43  ;;  %v640_v54 = vmul.f32 %v533_v49, %v533_v49  ;;  %v535_v55 = vpop.f32.mrb[15].mxu0 }
 0x141   : > { %v599_v56 = vpop.f32.mrb[15].mxu1  ;;  %795 = vst [vmem:[%s1284_s8 + $0x10] sm:$0xff] %v701_v51  ;;  %v656_v58 = vmul.f32 %v597_v50, %v597_v50 }
 0x142   : > { %v705_v59 = vsel %vm704_vm6, %v1287_v12, %v703_v52  ;;  %1083 = vrsqrt.f32 %v1300_v53  ;;  %vm725_vm12 = vcmp.eq.f32.partialorder %v1300_v53, inf  ;;  %v728_v26 = vand.u32 2147483648, %v1300_v53 }
 0x143   : > { %v708_v60 = vsel %vm706_vm7, %v707_v57, %v705_v59  ;;  %v1308_v61 = vadd.f32 %v656_v58, %v640_v54  ;;  %vm727_vm13 = vcmp.eq.f32.partialorder %v1300_v53, 0.0 }
 0x144   : > { %v1080_v62 = vpop.eup %1079  ;;  %796 = vst [vmem:[%s1284_s8 + $0x18] sm:$0xff] %v708_v60 }
 0x145   : > { %v710_v63 = vmul.f32 %v1080_v62, %v1290_v29  ;;  %1085 = vrsqrt.f32 %v1308_v61  ;;  %v538_v0 = vpop.f32.mrb[16].mxu0  ;;  %v602_v1 = vpop.f32.mrb[16].mxu1  ;;  %vm732_vm14 = vcmp.eq.f32.partialorder %v1308_v61, inf  ;;  %v735_v41 = vand.u32 2147483648, %v1308_v61 }
 0x146   : > { %v641_v3 = vmul.f32 %v538_v0, %v538_v0  ;;  %v657_v4 = vmul.f32 %v602_v1, %v602_v1  ;;  %v540_v5 = vpop.f32.mrb[17].mxu0  ;;  %v604_v6 = vpop.f32.mrb[17].mxu1  ;;  %vm734_vm15 = vcmp.eq.f32.partialorder %v1308_v61, 0.0 }
 0x147   : > { %v1082_v7 = vpop.eup %1081  ;;  %v712_v8 = vsel %vm711_vm8, %v1290_v29, %v710_v63  ;;  %v541_v9 = vpop.f32.mrb[18].mxu0 }
 0x148   : > { %v605_v10 = vpop.f32.mrb[18].mxu1  ;;  %v715_v11 = vsel %vm713_vm9, %v714_v2, %v712_v8  ;;  %v717_v12 = vmul.f32 %v1082_v7, %v1295_v37  ;;  %v1318_v13 = vadd.f32 %v657_v4, %v641_v3  ;;  %v642_v14 = vmul.f32 %v541_v9, %v541_v9  ;;  %v543_v15 = vpop.f32.mrb[19].mxu0 }
 0x149   : > { %v607_v16 = vpop.f32.mrb[19].mxu1  ;;  %797 = vst [vmem:[%s1284_s8 + $0x20] sm:$0xff] %v715_v11  ;;  %v658_v18 = vmul.f32 %v605_v10, %v605_v10 }
 0x14a   : > { %v719_v19 = vsel %vm718_vm10, %v1295_v37, %v717_v12  ;;  %1087 = vrsqrt.f32 %v1318_v13  ;;  %vm739_vm0 = vcmp.eq.f32.partialorder %v1318_v13, inf  ;;  %v742_v50 = vand.u32 2147483648, %v1318_v13 }
 0x14b   : > { %v722_v20 = vsel %vm720_vm11, %v721_v17, %v719_v19  ;;  %v1326_v21 = vadd.f32 %v658_v18, %v642_v14  ;;  %vm741_vm1 = vcmp.eq.f32.partialorder %v1318_v13, 0.0 }
 0x14c   : > { %v1084_v22 = vpop.eup %1083  ;;  %798 = vst [vmem:[%s1284_s8 + $0x28] sm:$0xff] %v722_v20 }
 0x14d   : > { %v724_v23 = vmul.f32 %v1084_v22, %v1300_v53  ;;  %1089 = vrsqrt.f32 %v1326_v21  ;;  %v546_v24 = vpop.f32.mrb[20].mxu0  ;;  %v610_v25 = vpop.f32.mrb[20].mxu1  ;;  %vm746_vm2 = vcmp.eq.f32.partialorder %v1326_v21, inf  ;;  %v749_v1 = vand.u32 2147483648, %v1326_v21 }
 0x14e   : > { %v643_v27 = vmul.f32 %v546_v24, %v546_v24  ;;  %v659_v28 = vmul.f32 %v610_v25, %v610_v25  ;;  %v548_v29 = vpop.f32.mrb[21].mxu0  ;;  %v612_v30 = vpop.f32.mrb[21].mxu1  ;;  %vm748_vm3 = vcmp.eq.f32.partialorder %v1326_v21, 0.0 }
 0x14f   : > { %v1086_v31 = vpop.eup %1085  ;;  %v726_v32 = vsel %vm725_vm12, %v1300_v53, %v724_v23  ;;  %v549_v33 = vpop.f32.mrb[22].mxu0 }
 0x150   : > { %v613_v34 = vpop.f32.mrb[22].mxu1  ;;  %v729_v35 = vsel %vm727_vm13, %v728_v26, %v726_v32  ;;  %v731_v36 = vmul.f32 %v1086_v31, %v1308_v61  ;;  %v1336_v37 = vadd.f32 %v659_v28, %v643_v27  ;;  %v644_v38 = vmul.f32 %v549_v33, %v549_v33  ;;  %v551_v39 = vpop.f32.mrb[23].mxu0 }
 0x151   : > { %v615_v40 = vpop.f32.mrb[23].mxu1  ;;  %799 = vst [vmem:[%s1284_s8 + $0x30] sm:$0xff] %v729_v35  ;;  %v660_v42 = vmul.f32 %v613_v34, %v613_v34 }
 0x152   : > { %v733_v43 = vsel %vm732_vm14, %v1308_v61, %v731_v36  ;;  %1091 = vrsqrt.f32 %v1336_v37  ;;  %vm753_vm4 = vcmp.eq.f32.partialorder %v1336_v37, inf  ;;  %v756_v10 = vand.u32 2147483648, %v1336_v37 }
 0x153   : > { %v736_v44 = vsel %vm734_vm15, %v735_v41, %v733_v43  ;;  %v1344_v45 = vadd.f32 %v660_v42, %v644_v38  ;;  %vm755_vm5 = vcmp.eq.f32.partialorder %v1336_v37, 0.0 }
 0x154   : > { %v1088_v46 = vpop.eup %1087  ;;  %800 = vst [vmem:[%s1284_s8 + $0x38] sm:$0xff] %v736_v44 }
 0x155   : > { %v738_v47 = vmul.f32 %v1088_v46, %v1318_v13  ;;  %1093 = vrsqrt.f32 %v1344_v45  ;;  %v554_v48 = vpop.f32.mrb[24].mxu0  ;;  %v618_v49 = vpop.f32.mrb[24].mxu1  ;;  %vm760_vm6 = vcmp.eq.f32.partialorder %v1344_v45, inf  ;;  %v763_v25 = vand.u32 2147483648, %v1344_v45 }
 0x156   : > { %v645_v51 = vmul.f32 %v554_v48, %v554_v48  ;;  %v661_v52 = vmul.f32 %v618_v49, %v618_v49  ;;  %v556_v53 = vpop.f32.mrb[25].mxu0  ;;  %v620_v54 = vpop.f32.mrb[25].mxu1  ;;  %vm762_vm7 = vcmp.eq.f32.partialorder %v1344_v45, 0.0 }
 0x157   : > { %v1090_v55 = vpop.eup %1089  ;;  %v740_v56 = vsel %vm739_vm0, %v1318_v13, %v738_v47  ;;  %v557_v57 = vpop.f32.mrb[26].mxu0 }
 0x158   : > { %v621_v58 = vpop.f32.mrb[26].mxu1  ;;  %v743_v59 = vsel %vm741_vm1, %v742_v50, %v740_v56  ;;  %v745_v60 = vmul.f32 %v1090_v55, %v1326_v21  ;;  %v677_v61 = vadd.f32 %v661_v52, %v645_v51  ;;  %v646_v62 = vmul.f32 %v557_v57, %v557_v57  ;;  %v559_v63 = vpop.f32.mrb[27].mxu0 }
 0x159   : > { %v623_v0 = vpop.f32.mrb[27].mxu1  ;;  %801 = vst [vmem:[%s1284_s8 + $0x40] sm:$0xff] %v743_v59  ;;  %v662_v2 = vmul.f32 %v621_v58, %v621_v58 }
 0x15a   : > { %v747_v3 = vsel %vm746_vm2, %v1326_v21, %v745_v60  ;;  %1095 = vrsqrt.f32 %v677_v61  ;;  %vm767_vm8 = vcmp.eq.f32.partialorder %v677_v61, inf  ;;  %v770_v32 = vand.u32 2147483648, %v677_v61 }
 0x15b   : > { %v750_v4 = vsel %vm748_vm3, %v749_v1, %v747_v3  ;;  %v678_v5 = vadd.f32 %v662_v2, %v646_v62  ;;  %vm769_vm9 = vcmp.eq.f32.partialorder %v677_v61, 0.0 }
 0x15c   : > { %v1092_v6 = vpop.eup %1091  ;;  %802 = vst [vmem:[%s1284_s8 + $0x48] sm:$0xff] %v750_v4 }
 0x15d   : > { %v752_v7 = vmul.f32 %v1092_v6, %v1336_v37  ;;  %1097 = vrsqrt.f32 %v678_v5  ;;  %v562_v8 = vpop.f32.mrb[28].mxu0  ;;  %v626_v9 = vpop.f32.mrb[28].mxu1  ;;  %vm774_vm10 = vcmp.eq.f32.partialorder %v678_v5, inf  ;;  %vm776_vm11 = vcmp.eq.f32.partialorder %v678_v5, 0.0 }
 0x15e   : > { %v647_v11 = vmul.f32 %v562_v8, %v562_v8  ;;  %v663_v12 = vmul.f32 %v626_v9, %v626_v9  ;;  %v564_v13 = vpop.f32.mrb[29].mxu0  ;;  %v628_v14 = vpop.f32.mrb[29].mxu1 }
 0x15f   : > { %v1094_v15 = vpop.eup %1093  ;;  %v754_v16 = vsel %vm753_vm4, %v1336_v37, %v752_v7  ;;  %v565_v17 = vpop.f32.mrb[30].mxu0  ;;  %v777_v37 = vand.u32 2147483648, %v678_v5 }
 0x160   : > { %v629_v18 = vpop.f32.mrb[30].mxu1  ;;  %v757_v19 = vsel %vm755_vm5, %v756_v10, %v754_v16  ;;  %v759_v20 = vmul.f32 %v1094_v15, %v1344_v45  ;;  %v679_v21 = vadd.f32 %v663_v12, %v647_v11  ;;  %v648_v22 = vmul.f32 %v565_v17, %v565_v17  ;;  %v567_v23 = vpop.f32.mrb[31].mxu0 }
 0x161   : > { %v631_v24 = vpop.f32.mrb[31].mxu1  ;;  %803 = vst [vmem:[%s1284_s8 + $0x50] sm:$0xff] %v757_v19  ;;  %v664_v26 = vmul.f32 %v629_v18, %v629_v18 }
 0x162   : > { %v761_v27 = vsel %vm760_vm6, %v1344_v45, %v759_v20  ;;  %1099 = vrsqrt.f32 %v679_v21  ;;  %vm781_vm12 = vcmp.eq.f32.partialorder %v679_v21, inf  ;;  %v784_v42 = vand.u32 2147483648, %v679_v21 }
 0x163   : > { %v764_v28 = vsel %vm762_vm7, %v763_v25, %v761_v27  ;;  %v680_v29 = vadd.f32 %v664_v26, %v648_v22  ;;  %vm783_vm13 = vcmp.eq.f32.partialorder %v679_v21, 0.0 }
 0x164   : > { %v1096_v30 = vpop.eup %1095  ;;  %804 = vst [vmem:[%s1284_s8 + $0x58] sm:$0xff] %v764_v28 }
 0x165   : > { %v766_v31 = vmul.f32 %v1096_v30, %v677_v61  ;;  %1101 = vrsqrt.f32 %v680_v29  ;;  %vm788_vm14 = vcmp.eq.f32.partialorder %v680_v29, inf  ;;  %v791_v47 = vand.u32 2147483648, %v680_v29 }
 0x166   : > { %vm790_vm15 = vcmp.eq.f32.partialorder %v680_v29, 0.0 }
 0x167   : > { %v1098_v33 = vpop.eup %1097  ;;  %v768_v34 = vsel %vm767_vm8, %v677_v61, %v766_v31 }
 0x168   : > { %v771_v35 = vsel %vm769_vm9, %v770_v32, %v768_v34  ;;  %v773_v36 = vmul.f32 %v1098_v33, %v678_v5 }
 0x169   : > { %805 = vst [vmem:[%s1284_s8 + $0x60] sm:$0xff] %v771_v35 }
 0x16a   : > { %v775_v38 = vsel %vm774_vm10, %v678_v5, %v773_v36 }
 0x16b   : > { %v778_v39 = vsel %vm776_vm11, %v777_v37, %v775_v38 }
 0x16c   : > { %v1100_v40 = vpop.eup %1099  ;;  %806 = vst [vmem:[%s1284_s8 + $0x68] sm:$0xff] %v778_v39 }
 0x16d   : > { %v780_v41 = vmul.f32 %v1100_v40, %v679_v21 }
 0x16f   : > { %v1102_v43 = vpop.eup %1101  ;;  %v782_v44 = vsel %vm781_vm12, %v679_v21, %v780_v41 }
 0x170   : > { %v785_v45 = vsel %vm783_vm13, %v784_v42, %v782_v44  ;;  %v787_v46 = vmul.f32 %v1102_v43, %v680_v29 }
 0x171   : > { %807 = vst [vmem:[%s1284_s8 + $0x70] sm:$0xff] %v785_v45 }
 0x172   : > { %v789_v48 = vsel %vm788_vm14, %v680_v29, %v787_v46 }
 0x173   : > { %v792_v49 = vsel %vm790_vm15, %v791_v47, %v789_v48 }
 0x174   : > { %808 = vst [vmem:[%s1284_s8 + $0x78] sm:$0xff] %v792_v49 }
 0x175 PF: > { %s12_s11 = sadd.s32 1, %s1125_s11   ;;  %s1388_s9 = smov %s1121_s10 }
 0x176   : > { %p9_p5 = scmp.ge.s32.totalorder %s12_s11, 4   ;;  %s1389_s10 = smov %s1391_s12 }
 0x178   :  { %11 = sbr.rel (!%p9_p5) target bundleno = 2 (0x2), region = 58 }

</bundles_post_ra>
